<compile_context>
chip_gen: v5e
topology: v5e:2x2
jax: 0.10.0
libtpu: 0.0.40
codegen_flags: <defaults>
</compile_context>

<pallas_src>
import functools

import jax
import jax.numpy as jnp
from jax.experimental import pallas as pl
from jax.experimental.pallas import tpu as pltpu

_LANE = 128


# --------------------------------------------------------------------------
# Kernels
# --------------------------------------------------------------------------
def _bn_fused_kernel(x_ref, gamma_ref, beta_ref, o_ref, *, eps):
    # Whole batch resident for this channel tile; single-pass statistics.
    x = x_ref[...].astype(jnp.float32)                       # (N, TILE_C)
    mean = jnp.mean(x, axis=0, keepdims=True)                # (1, TILE_C)
    msq = jnp.mean(x * x, axis=0, keepdims=True)             # E[x^2]
    var = jnp.maximum(msq - mean * mean, 0.0)                # biased, clamped
    scale = gamma_ref[...] * jax.lax.rsqrt(var + eps)
    shift = beta_ref[...] - mean * scale
    o_ref[...] = (x * scale + shift).astype(o_ref.dtype)     # 1 mul + 1 add /elem


def _bn_stats_kernel(x_ref, sum_ref, sq_ref):
    # Accumulate per-channel sum / sum-of-squares over the ("arbitrary") N axis.
    @pl.when(pl.program_id(1) == 0)
    def _():
        sum_ref[...] = jnp.zeros_like(sum_ref)
        sq_ref[...] = jnp.zeros_like(sq_ref)

    x = x_ref[...].astype(jnp.float32)                       # (TILE_N, TILE_C)
    sum_ref[...] += jnp.sum(x, axis=0, keepdims=True)
    sq_ref[...] += jnp.sum(x * x, axis=0, keepdims=True)


def _bn_normalize_kernel(x_ref, scale_ref, shift_ref, o_ref):
    x = x_ref[...].astype(jnp.float32)
    o_ref[...] = (x * scale_ref[...] + shift_ref[...]).astype(o_ref.dtype)


# --------------------------------------------------------------------------
# Tile / budget selection helpers
# --------------------------------------------------------------------------
def _round_up(v, m):
    return (v + m - 1) // m * m


def _largest_divisor_leq(k, limit):
    limit = max(1, min(int(limit), k))
    for d in range(limit, 0, -1):
        if k % d == 0:
            return d
    return 1


def _vmem_params():
    """Generation-aware (tile-sizing VMEM budget, scoped vmem_limit_bytes)."""
    try:
        vmem = int(pltpu.get_tpu_info().vmem_capacity_bytes)
    except Exception:
        return 24 << 20, 64 << 20           # unknown chip: conservative defaults
    limit = min(96 << 20, (vmem * 3) // 4)  # v5e/v6e: 96 MiB of 128; v7x: 48 of 64
    return limit // 2, limit                # keep tiles to ~half the scoped limit


def _choose_tile_c(c_pad, bytes_per_lane, budget, prefer_split=True):
    """Largest 128-multiple channel tile that divides c_pad, fits the budget,
    and (when possible) leaves >= 2 tiles so both v7x TensorCores get work."""
    k = c_pad // _LANE
    limit = max(1, min(k, int(budget // max(bytes_per_lane * _LANE, 1))))
    if prefer_split and k >= 2:
        limit = max(1, min(limit, k // 2))
    return _LANE * _largest_divisor_leq(k, limit)


def _choose_tile_n(n_pad8, factor, budget, target_rows=1024):
    """Batch-tile rows (multiple of 8 dividing n_pad8) for the two-pass path."""
    units = n_pad8 // 8
    max_rows = max(8, int(budget // max(factor * _LANE, 1)))
    limit = max(1, min(units, min(max_rows, target_rows) // 8))
    return 8 * _largest_divisor_leq(units, limit)


# --------------------------------------------------------------------------
# Wrapper
# --------------------------------------------------------------------------
def batchnorm1d(x, gamma, beta, eps=1e-5, *, vmem_budget_bytes=None):
    """x: (N, C) float array; gamma/beta: (C,) per-channel affine params."""
    n, c = x.shape
    budget, vmem_limit = _vmem_params()
    if vmem_budget_bytes is not None:
        budget = vmem_budget_bytes

    in_b = jnp.dtype(x.dtype).itemsize
    out_b = in_b
    # Per-element VMEM cost: double-buffered input + output tiles plus ~2 f32
    # in-kernel temporaries (x cast to f32, one elementwise product).
    factor = 2 * in_b + 2 * out_b + 8

    # Pad C only to the 128-lane minimum (skipped entirely when lane-aligned).
    c_pad = _round_up(c, _LANE)
    pad_c = c_pad - c

    gamma_f = gamma.astype(jnp.float32)
    beta_f = beta.astype(jnp.float32)
    if pad_c:
        # Padded columns: mean=0, var=0 -> rsqrt(eps) finite; output 0, sliced off.
        gamma_f = jnp.pad(gamma_f, (0, pad_c), constant_values=1.0)
        beta_f = jnp.pad(beta_f, (0, pad_c))
    gamma2d = gamma_f.reshape(1, c_pad)
    beta2d = beta_f.reshape(1, c_pad)

    # ---------------- Fused single-pass path (whole batch resident) ----------
    if n * factor * _LANE <= budget:
        x_p = jnp.pad(x, ((0, 0), (0, pad_c))) if pad_c else x
        tile_c = _choose_tile_c(c_pad, n * factor, budget)
        out = pl.pallas_call(
            functools.partial(_bn_fused_kernel, eps=eps),
            out_shape=jax.ShapeDtypeStruct((n, c_pad), x.dtype),
            grid=(c_pad // tile_c,),
            in_specs=[
                pl.BlockSpec((n, tile_c), lambda j: (0, j)),
                pl.BlockSpec((1, tile_c), lambda j: (0, j)),
                pl.BlockSpec((1, tile_c), lambda j: (0, j)),
            ],
            out_specs=pl.BlockSpec((n, tile_c), lambda j: (0, j)),
            compiler_params=pltpu.CompilerParams(
                dimension_semantics=("parallel",),
                vmem_limit_bytes=vmem_limit,
            ),
        )(x_p, gamma2d, beta2d)
        return out[:, :c] if pad_c else out

    # ---------------- Large-N two-pass fallback (batch-tiled) ----------------
    n_pad = _round_up(n, 8)
    tile_n = _choose_tile_n(n_pad, factor, budget)
    pad_n = n_pad - n
    x_p = jnp.pad(x, ((0, pad_n), (0, pad_c))) if (pad_n or pad_c) else x
    tile_c = _choose_tile_c(c_pad, tile_n * factor, budget)
    grid = (c_pad // tile_c, n_pad // tile_n)

    sums, sqs = pl.pallas_call(
        _bn_stats_kernel,
        out_shape=(jax.ShapeDtypeStruct((1, c_pad), jnp.float32),
                   jax.ShapeDtypeStruct((1, c_pad), jnp.float32)),
        grid=grid,
        in_specs=[pl.BlockSpec((tile_n, tile_c), lambda j, k: (k, j))],
        out_specs=(pl.BlockSpec((1, tile_c), lambda j, k: (0, j)),
                   pl.BlockSpec((1, tile_c), lambda j, k: (0, j))),
        compiler_params=pltpu.CompilerParams(
            dimension_semantics=("parallel", "arbitrary"),
            vmem_limit_bytes=vmem_limit,
        ),
    )(x_p)

    inv_n = 1.0 / n                       # true batch size (zero rows add 0)
    mean = sums * inv_n
    var = jnp.maximum(sqs * inv_n - mean * mean, 0.0)
    scale = gamma2d * jax.lax.rsqrt(var + eps)
    shift = beta2d - mean * scale

    out = pl.pallas_call(
        _bn_normalize_kernel,
        out_shape=jax.ShapeDtypeStruct((n_pad, c_pad), x.dtype),
        grid=grid,
        in_specs=[
            pl.BlockSpec((tile_n, tile_c), lambda j, k: (k, j)),
            pl.BlockSpec((1, tile_c), lambda j, k: (0, j)),
            pl.BlockSpec((1, tile_c), lambda j, k: (0, j)),
        ],
        out_specs=pl.BlockSpec((tile_n, tile_c), lambda j, k: (k, j)),
        compiler_params=pltpu.CompilerParams(
            dimension_semantics=("parallel", "parallel"),
            vmem_limit_bytes=vmem_limit,
        ),
    )(x_p, scale, shift)

    return out[:n, :c] if (pad_n or pad_c) else out


# --------------------------------------------------------------------------
# Self-test
# --------------------------------------------------------------------------
if __name__ == "__main__":
    key = jax.random.PRNGKey(0)
    k1, k2 = jax.random.split(key)

    # --- Test 1: fused single-pass path (small shapes implied by the module).
    N, C = 8, 32
    x = jax.random.normal(k1, (N, C), dtype=jnp.float32) * 2.0 + 0.5
    gamma = jnp.ones((C,), dtype=jnp.float32)   # nn.BatchNorm1d init: weight=1
    beta = jnp.zeros((C,), dtype=jnp.float32)   #                     bias=0
    out = jax.block_until_ready(batchnorm1d(x, gamma, beta))

    mean = jnp.mean(x, axis=0, keepdims=True)
    var = jnp.mean((x - mean) ** 2, axis=0, keepdims=True)
    ref = (x - mean) / jnp.sqrt(var + 1e-5) * gamma + beta
    assert out.shape == (N, C)
    assert jnp.allclose(out, ref, atol=1e-4, rtol=1e-4), "fused path mismatch"

    # --- Test 2: large-N two-pass fallback (forced via a tiny tile budget).
    N2, C2 = 512, 256
    x2 = jax.random.normal(k2, (N2, C2), dtype=jnp.float32) * 1.5 - 0.25
    gamma2 = jnp.linspace(0.5, 1.5, C2, dtype=jnp.float32)
    beta2 = jnp.linspace(-0.2, 0.2, C2, dtype=jnp.float32)
    out2 = jax.block_until_ready(
        batchnorm1d(x2, gamma2, beta2, vmem_budget_bytes=1 << 20))

    mean2 = jnp.mean(x2, axis=0, keepdims=True)
    var2 = jnp.mean((x2 - mean2) ** 2, axis=0, keepdims=True)
    ref2 = (x2 - mean2) / jnp.sqrt(var2 + 1e-5) * gamma2 + beta2
    assert out2.shape == (N2, C2)
    assert jnp.allclose(out2, ref2, atol=1e-4, rtol=1e-4), "two-pass mismatch"

    print("KERNEL_OK")
</pallas_src>

<mosaic_0001>
module attributes {stable_mosaic.version = 11 : i64} {
  func.func @_bn_fused_kernel(%arg0: i32, %arg1: memref<8x128xf32, #tpu.memory_space<vmem>>, %arg2: memref<1x128xf32, #tpu.memory_space<vmem>>, %arg3: memref<1x128xf32, #tpu.memory_space<vmem>>, %arg4: memref<8x128xf32, #tpu.memory_space<vmem>>) attributes {dimension_semantics = [#tpu.dimension_semantics<parallel>], iteration_bounds = array<i64: 1>, scalar_prefetch = 0 : i64, scratch_operands = 0 : i64, tpu.core_type = #tpu.core_type<tc>, window_params = [{transform_indices = @transform_0, window_bounds = array<i64: 8, 128>}, {transform_indices = @transform_1, window_bounds = array<i64: 1, 128>}, {transform_indices = @transform_2, window_bounds = array<i64: 1, 128>}, {transform_indices = @transform_3, window_bounds = array<i64: 8, 128>}]} {
    %c0 = arith.constant 0 : index
    %c0_0 = arith.constant 0 : index
    %0 = vector.load %arg1[%c0, %c0_0] : memref<8x128xf32, #tpu.memory_space<vmem>>, vector<8x128xf32>
    %cst = arith.constant dense<0.000000e+00> : vector<128xf32>
    %1 = vector.multi_reduction <add>, %0, %cst [0] : vector<8x128xf32> to vector<128xf32>
    %2 = vector.shape_cast %1 : vector<128xf32> to vector<1x128xf32>
    %cst_1 = arith.constant 8.000000e+00 : f32
    %3 = vector.broadcast %cst_1 : f32 to vector<1x128xf32>
    %4 = arith.divf %2, %3 : vector<1x128xf32>
    %5 = arith.mulf %0, %0 : vector<8x128xf32>
    %cst_2 = arith.constant dense<0.000000e+00> : vector<128xf32>
    %6 = vector.multi_reduction <add>, %5, %cst_2 [0] : vector<8x128xf32> to vector<128xf32>
    %7 = vector.shape_cast %6 : vector<128xf32> to vector<1x128xf32>
    %cst_3 = arith.constant 8.000000e+00 : f32
    %8 = vector.broadcast %cst_3 : f32 to vector<1x128xf32>
    %9 = arith.divf %7, %8 : vector<1x128xf32>
    %10 = arith.mulf %4, %4 : vector<1x128xf32>
    %11 = arith.subf %9, %10 : vector<1x128xf32>
    %cst_4 = arith.constant 0.000000e+00 : f32
    %12 = vector.broadcast %cst_4 : f32 to vector<1x128xf32>
    %13 = arith.maximumf %11, %12 : vector<1x128xf32>
    %c0_5 = arith.constant 0 : index
    %c0_6 = arith.constant 0 : index
    %14 = vector.load %arg2[%c0_5, %c0_6] : memref<1x128xf32, #tpu.memory_space<vmem>>, vector<1x128xf32>
    %cst_7 = arith.constant 9.99999974E-6 : f32
    %15 = vector.broadcast %cst_7 : f32 to vector<1x128xf32>
    %16 = arith.addf %13, %15 : vector<1x128xf32>
    %17 = math.rsqrt %16 : vector<1x128xf32>
    %18 = arith.mulf %14, %17 : vector<1x128xf32>
    %c0_8 = arith.constant 0 : index
    %c0_9 = arith.constant 0 : index
    %19 = vector.load %arg3[%c0_8, %c0_9] : memref<1x128xf32, #tpu.memory_space<vmem>>, vector<1x128xf32>
    %20 = arith.mulf %4, %18 : vector<1x128xf32>
    %21 = arith.subf %19, %20 : vector<1x128xf32>
    %22 = vector.broadcast %18 : vector<1x128xf32> to vector<8x128xf32>
    %23 = arith.mulf %0, %22 : vector<8x128xf32>
    %24 = vector.broadcast %21 : vector<1x128xf32> to vector<8x128xf32>
    %25 = arith.addf %23, %24 : vector<8x128xf32>
    %c0_10 = arith.constant 0 : index
    %c0_11 = arith.constant 0 : index
    %26 = vector.load %arg4[%c0_10, %c0_11] : memref<8x128xf32, #tpu.memory_space<vmem>>, vector<8x128xf32>
    tpu.vector_store %arg4[%c0_10, %c0_11], %25 {strides = array<i32>} : memref<8x128xf32, #tpu.memory_space<vmem>>, vector<8x128xf32>,
    return
  }
  func.func @transform_0(%arg0: i32) -> (i32, i32) {
    %c0_i32 = arith.constant 0 : i32
    %c0_i32_0 = arith.constant 0 : i32
    return %c0_i32, %arg0 : i32, i32
  }
  func.func @transform_1(%arg0: i32) -> (i32, i32) {
    %c0_i32 = arith.constant 0 : i32
    %c0_i32_0 = arith.constant 0 : i32
    return %c0_i32, %arg0 : i32, i32
  }
  func.func @transform_2(%arg0: i32) -> (i32, i32) {
    %c0_i32 = arith.constant 0 : i32
    %c0_i32_0 = arith.constant 0 : i32
    return %c0_i32, %arg0 : i32, i32
  }
  func.func @transform_3(%arg0: i32) -> (i32, i32) {
    %c0_i32 = arith.constant 0 : i32
    %c0_i32_0 = arith.constant 0 : i32
    return %c0_i32, %arg0 : i32, i32
  }
}

</mosaic_0001>

<bundles_post_ra>
// kernel: tpu_custom_call.1
= control target key start
LH: loop header
LB: loop body
LE: loop exit
PB: predicated region body
PF: predicated region fallthrough
CT: control target
= control target key end

     0   :  { %8 = vsyncpa [#allocation3], 0  ;;  %s234_s0 = inlined_call_operand.hbm [shape: f32[8,128], index: 0, kind: input, shape index: {}]   ;;  %s235_s1 = inlined_call_operand.hbm [shape: f32[1,128], index: 1, kind: input, shape index: {}]   ;;  %s236_s2 = inlined_call_operand.vmem [shape: f32[1,128], index: 2, kind: input, shape index: {}]   ;;  %s237_s3 = inlined_call_operand.hbm [shape: f32[8,128], index: 3, kind: output, shape index: {}]  }
   0x1   :  { %9 = vsyncpa [#allocation6], 0 }
   0x2   :  { %10 = vsyncpa [#allocation4], 0  ;;  %s16_s14 = sshll.u32 %s234_s0, 4  ;;  %s198_s15 = smov [#allocation2]   ;;  %s17_s14 = int_to_ptr.hbm [resolvable:$true] %s16_s14 }
   0x3   :  { %s18_s16 = sshll.u32 %s198_s15, 4  ;;  %s27_s19 = sshll.u32 %s235_s1, 4  ;;  %s19_s16 = int_to_ptr.vmem [resolvable:$true] %s18_s16  ;;  %s28_s19 = int_to_ptr.hbm [resolvable:$true] %s27_s19 }
   0x4   :  { %21 = dma.hbm_to_vmem [thread:$0]  %s17_s14, 128, %s19_s16, [#allocation3]  }
   0x5   :  { %s199_s20 = smov [#allocation5]  }
   0x6   :  { %s29_s21 = sshll.u32 %s199_s20, 4  ;;  %s30_s21 = int_to_ptr.vmem [resolvable:$true] %s29_s21 }
   0x7   :  { %32 = dma.hbm_to_vmem [thread:$0]  %s28_s19, 16, %s30_s21, [#allocation6]  }
   0x8   :  { %192 = dma.done.wait [#allocation3], 128  }
   0x9   :  { %193 = vsyncadd [#allocation3], 4294967168 }
   0xa   :  { %194 = dma.done.wait [#allocation6], 16  }
   0xb   :  { %195 = vsyncadd [#allocation6], 4294967280  ;;  %v200_v0 = vmov 8.0   ;;  %v43_v2 = vld [vmem:[#allocation2] sm:$0xff]  ;;  %v69_v32 = vld [vmem:[#allocation5] sm:$0x1] }
   0xc   :  { %116 = vrcp.f32 %v200_v0  ;;  %v44_v3 = vrot.slane %v43_v2, 4  ;;  %v58_v5 = vmul.f32 %v43_v2, %v43_v2  ;;  %v82_v36 = vld [vmem:[%s236_s2] sm:$0x1]  ;;  %s201_s22 = smov [#allocation7]   ;;  %s101_s26 = sshll.u32 %s237_s3, 4  ;;  %s102_s26 = int_to_ptr.hbm [resolvable:$true] %s101_s26 }
   0xd   :  { %s99_s23 = sshll.u32 %s201_s22, 4  ;;  %s100_s23 = int_to_ptr.vmem [resolvable:$true] %s99_s23 }
   0xe   :  { %v45_v6 = vadd.f32 %v44_v3, %v43_v2  ;;  %v59_v8 = vrot.slane %v58_v5, 4 }
  0x10   :  { %v46_v9 = vrot.slane %v45_v6, 2  ;;  %v60_v11 = vadd.f32 %v59_v8, %v58_v5 }
  0x12   :  { %v117_v1 = vpop.eup %116  ;;  %v47_v12 = vadd.f32 %v46_v9, %v45_v6  ;;  %v61_v14 = vrot.slane %v60_v11, 2 }
  0x13   :  { %v51_v4 = vmul.f32 8.0, %v117_v1  ;;  %vm55_vm0 = vweird.f32 %v117_v1 }
  0x14   :  { %v48_v15 = vrot.slane %v47_v12, 1  ;;  %v62_v16 = vadd.f32 %v61_v14, %v60_v11 }
  0x15   :  { %v52_v7 = vsub.f32 1.0, %v51_v4 }
  0x16   :  { %v49_v18 = vadd.f32 %v48_v15, %v47_v12  ;;  %v63_v19 = vrot.slane %v62_v16, 1 }
  0x17   :  { %v53_v10 = vmul.f32 %v117_v1, %v52_v7 }
  0x18   :  { %v64_v21 = vadd.f32 %v63_v19, %v62_v16 }
  0x19   :  { %v54_v13 = vadd.f32 %v117_v1, %v53_v10 }
  0x1b   :  { %v56_v17 = vsel %vm55_vm0, %v117_v1, %v54_v13 }
  0x1c   :  { %v57_v20 = vmul.f32 %v56_v17, %v49_v18  ;;  %v65_v22 = vmul.f32 %v64_v21, %v56_v17 }
  0x1e   :  { %v66_v23 = vmul.f32 %v57_v20, %v57_v20 }
  0x20   :  { %v67_v24 = vsub.f32 %v65_v22, %v66_v23 }
  0x22   :  { %v68_v25 = vmax.f32 %v67_v24, 0.0 }
  0x24   :  { %v70_v26 = vadd.f32 1e-05, %v68_v25 }
  0x26   :  { %118 = vrsqrt.f32 %v70_v26  ;;  %vm77_vm1 = vweird.f32 %v70_v26 }
  0x2c   :  { %v119_v27 = vpop.eup %118 }
  0x2d   :  { %v72_v28 = vmul.f32 %v119_v27, %v70_v26  ;;  %vm78_vm2 = vweird.f32 %v119_v27 }
  0x2e   :  { %vm79_vm3 = vmor %vm77_vm1, %vm78_vm2 }
  0x2f   :  { %v73_v29 = vmul.f32 %v119_v27, %v72_v28 }
  0x31   :  { %v74_v30 = vmul.f32 0.5, %v73_v29 }
  0x33   :  { %v75_v31 = vsub.f32 1.5, %v74_v30 }
  0x35   :  { %v76_v33 = vmul.f32 %v119_v27, %v75_v31 }
  0x37   :  { %v80_v34 = vsel %vm79_vm3, %v119_v27, %v76_v33 }
  0x38   :  { %v81_v35 = vmul.f32 %v80_v34, %v69_v32 }
  0x3a   :  { %v83_v37 = vmul.f32 %v81_v35, %v57_v20  ;;  %v86_v38 = vperm.slane %v81_v35, 0 }
  0x3c   :  { %v84_v39 = vsub.f32 %v82_v36, %v83_v37  ;;  %v88_v40 = vmul.f32 %v86_v38, %v43_v2 }
  0x3e   :  { %v90_v41 = vperm.slane %v84_v39, 0 }
  0x40   :  { %v92_v42 = vadd.f32 %v90_v41, %v88_v40 }
  0x42   :  { %93 = vst [vmem:[#allocation7] sm:$0xff] %v92_v42 }
  0x43   :  { %104 = dma.vmem_to_hbm [thread:$0]  %s100_s23, 128, %s102_s26, [#allocation4]  }
  0x44   :  { %196 = dma.done.wait [#allocation4], 128  }
  0x45   :  { %197 = vsyncadd [#allocation4], 4294967168 }
  0x46   :  { %109 = vsyncpa [#allocation3], 1 }
  0x47   :  { %110 = vsyncpa [#allocation6], 1 }
  0x48   :  { %111 = vsyncpa [#allocation4], 1 }

</bundles_post_ra>
